<compile_context>
chip_gen: v5e
topology: v5e:2x2
jax: 0.10.0
libtpu: 0.0.40
codegen_flags: <defaults>
</compile_context>

<pallas_src>
import functools

import jax
import jax.numpy as jnp
from jax.experimental import pallas as pl
from jax.experimental.pallas import tpu as pltpu


def _round_up(v, m):
    return (v + m - 1) // m * m


def _vmem_capacity_bytes():
    """Physical VMEM per core for this TPU generation (conservative fallback)."""
    try:
        return int(pltpu.get_tpu_info().vmem_capacity_bytes)
    except Exception:
        return 64 * 1024 * 1024  # v7x-sized conservative fallback


def _mlp_sigmoid_kernel(*refs):
    """refs = (x_ref, w_ref_0, ..., w_ref_{L-1}, out_ref).

    h = x; for every weight but the last: h = sigmoid(h @ W_i); out = h @ W_last.
    Matmuls run on the MXU with bf16 operands / f32 accumulation; sigmoid uses
    the tanh form so only one EUP op per element is needed.
    """
    x_ref = refs[0]
    out_ref = refs[-1]
    w_refs = refs[1:-1]

    h = x_ref[...]  # bf16 activations feed the MXU directly.
    for w_ref in w_refs[:-1]:
        z = jnp.dot(h, w_ref[...], preferred_element_type=jnp.float32)  # f32 acc
        # sigmoid(z) = 0.5 * (1 + tanh(z/2)): one EUP push per element; the
        # mul/add ride the VALU slots (which have slack).  No exp(-z) -> inf
        # edge case.  Kept in f32 (v5e has no bf16 VALU/EUP).
        s = 0.5 * (1.0 + jnp.tanh(0.5 * z))
        h = s.astype(jnp.bfloat16)  # back to bf16 for the next MXU pass
    z = jnp.dot(h, w_refs[-1][...], preferred_element_type=jnp.float32)
    out_ref[...] = z.astype(out_ref.dtype)


def prepare_weights(weights_t):
    """One-time weight prep (run at init, NOT per forward call).

    Zero-pads each (in, out) weight to multiples of 128 on both feature dims
    (lane-dense MXU tiles) and casts to bf16.  Padding is exact: padded rows /
    columns are zero, so padded activation columns never contribute.
    """
    w_p = []
    for w in weights_t:
        ip = _round_up(w.shape[0], 128)
        op = _round_up(w.shape[1], 128)
        wp = jnp.zeros((ip, op), jnp.bfloat16)
        wp = wp.at[: w.shape[0], : w.shape[1]].set(w.astype(jnp.bfloat16))
        w_p.append(wp)
    return tuple(w_p)


@functools.partial(
    jax.jit, static_argnames=("input_dim", "num_classes", "batch_tile")
)
def fully_connected_sigmoid_forward(x, w_padded, *, input_dim, num_classes,
                                    batch_tile=512):
    """Run the fused MLP forward.

    Args:
      x: input of any shape (B, ...) — flattened to (B, input_dim), matching
         `x.view(x.size(0), input_dim)` in the PyTorch module.
      w_padded: tuple of pre-padded bf16 weights from `prepare_weights`.
      input_dim: original (unpadded) input feature dim.
      num_classes: original (unpadded) number of output classes.
      batch_tile: max batch tile size for the pipelined grid.

    Returns:
      logits of shape (B, num_classes), float32.
    """
    batch = x.shape[0]
    in_pads = [w.shape[0] for w in w_padded]
    out_pads = [w.shape[1] for w in w_padded]
    out_pad = out_pads[-1]

    # batch -> multiple of 16 (bf16 sublane packing).  For large batches keep
    # at least 2 grid steps so dimension_semantics=("parallel",) can shard the
    # two v7x TensorCores (no-op on single-TC v5e/v6e).
    b_pad = _round_up(batch, 16)
    tb = min(batch_tile, max(16, _round_up(b_pad // 2, 16)))
    tb = min(tb, b_pad)
    b_pad = _round_up(b_pad, tb)
    grid = (b_pad // tb,)

    # x pad + single cast (no redundant f32 round-trip); fuses under jit.
    x2d = x.reshape(batch, input_dim).astype(jnp.bfloat16)
    x_p = jnp.zeros((b_pad, in_pads[0]), jnp.bfloat16)
    x_p = x_p.at[:batch, :input_dim].set(x2d)

    # x/out are tiled over batch (double-buffered by Pallas); weight index_maps
    # return a constant block so weights are DMA'd once and stay VMEM-resident.
    in_specs = [pl.BlockSpec((tb, in_pads[0]), lambda i: (i, 0))]
    in_specs += [pl.BlockSpec(w.shape, lambda i: (0, 0)) for w in w_padded]
    out_spec = pl.BlockSpec((tb, out_pad), lambda i: (i, 0))

    # VMEM budget.  Pallas allocates two buffers per input even for constant
    # index_maps, so weights are counted 2x.  Cap at 80% of this generation's
    # physical VMEM (~51 MiB v7x, ~102 MiB v5e/v6e) to leave Mosaic scratch
    # headroom.
    # NOTE: once depth * width^2 * 2B approaches VMEM, switch to a K/N
    # weight-tiled / per-layer-grid path (or pl.Buffered(1) weight specs);
    # fine at MLP-on-MNIST scale widths.
    weight_bytes = sum(w.size * 2 for w in w_padded)
    tile_bytes = tb * in_pads[0] * 2 + tb * out_pad * 4
    act_bytes = 4 * tb * max(out_pads) * 4
    needed = 2 * weight_bytes + 2 * tile_bytes + act_bytes
    cap = int(_vmem_capacity_bytes() * 0.8)
    vmem_limit = min(max(int(needed * 1.25), 32 * 1024 * 1024), cap)

    flops = 2 * b_pad * sum(ip * op for ip, op in zip(in_pads, out_pads))
    transcendentals = b_pad * sum(out_pads[:-1])  # one tanh per hidden element
    bytes_accessed = x_p.size * 2 + weight_bytes + b_pad * out_pad * 4

    fn = pl.pallas_call(
        _mlp_sigmoid_kernel,
        out_shape=jax.ShapeDtypeStruct((b_pad, out_pad), jnp.float32),
        grid=grid,
        in_specs=in_specs,
        out_specs=out_spec,
        compiler_params=pltpu.CompilerParams(
            dimension_semantics=("parallel",),  # shards batch tiles across TCs on v7x
            vmem_limit_bytes=vmem_limit,
        ),
        cost_estimate=pl.CostEstimate(
            flops=flops,
            transcendentals=transcendentals,
            bytes_accessed=bytes_accessed,
        ),
    )
    out_p = fn(x_p, *w_padded)
    return out_p[:batch, :num_classes]


def init_params(key, input_dim, width, depth, num_classes):
    """Deterministic init matching nn.Linear(bias=False) shapes.

    PyTorch nn.Linear weight shape is (out_features, in_features); we build
    those and return the transposed (in, out) versions used by the kernel.
    """
    dims = [input_dim] + [width] * (depth - 1) + [num_classes]
    weights_t = []
    for i in range(depth):
        fan_in, fan_out = dims[i], dims[i + 1]
        key, sub = jax.random.split(key)
        bound = 1.0 / jnp.sqrt(fan_in)
        w = jax.random.uniform(sub, (fan_out, fan_in),
                               minval=-bound, maxval=bound,
                               dtype=jnp.float32)       # (out, in) like PyTorch
        weights_t.append(w.T)                            # (in, out) for kernel
    return weights_t


def reference_forward(x, weights_t):
    """Pure-JAX f32 reference for correctness checking."""
    batch = x.shape[0]
    h = x.reshape(batch, weights_t[0].shape[0]).astype(jnp.float32)
    for w in weights_t[:-1]:
        h = jax.nn.sigmoid(h @ w)
    return h @ weights_t[-1]


if __name__ == "__main__":
    # Module defaults: input 28x28 -> input_dim=784, width=50, depth=3,
    # num_classes=10; small batch of 2.
    batch, chans, spatial = 2, 1, 28
    input_dim = chans * spatial * spatial
    width, depth, num_classes = 50, 3, 10

    key = jax.random.PRNGKey(0)
    key, xk = jax.random.split(key)
    x = jax.random.normal(xk, (batch, chans, spatial, spatial), dtype=jnp.float32)

    weights_t = init_params(key, input_dim, width, depth, num_classes)
    # One-time weight pad + bf16 cast (out of the per-call hot path).
    w_padded = prepare_weights(weights_t)

    out = fully_connected_sigmoid_forward(
        x, w_padded, input_dim=input_dim, num_classes=num_classes)
    out = jax.block_until_ready(out)

    ref = reference_forward(x, weights_t)
    assert out.shape == (batch, num_classes)
    # bf16 MXU operands -> loosened tolerance vs f32 reference.
    assert jnp.allclose(out, ref, atol=5e-2, rtol=5e-2), "mismatch vs reference"

    print("KERNEL_OK")
</pallas_src>

<mosaic_0001>
module attributes {stable_mosaic.version = 11 : i64} {
  func.func @_mlp_sigmoid_kernel(%arg0: i32, %arg1: memref<16x896xbf16, #tpu.memory_space<vmem>>, %arg2: memref<896x128xbf16, #tpu.memory_space<vmem>>, %arg3: memref<128x128xbf16, #tpu.memory_space<vmem>>, %arg4: memref<128x128xbf16, #tpu.memory_space<vmem>>, %arg5: memref<16x128xf32, #tpu.memory_space<vmem>>) attributes {dimension_semantics = [#tpu.dimension_semantics<parallel>], iteration_bounds = array<i64: 1>, scalar_prefetch = 0 : i64, scratch_operands = 0 : i64, tpu.core_type = #tpu.core_type<tc>, window_params = [{transform_indices = @transform_0, window_bounds = array<i64: 16, 896>}, {pipeline_mode = #tpu.pipeline_mode<synchronous>, transform_indices = @transform_1, window_bounds = array<i64: 896, 128>}, {pipeline_mode = #tpu.pipeline_mode<synchronous>, transform_indices = @transform_2, window_bounds = array<i64: 128, 128>}, {pipeline_mode = #tpu.pipeline_mode<synchronous>, transform_indices = @transform_3, window_bounds = array<i64: 128, 128>}, {transform_indices = @transform_4, window_bounds = array<i64: 16, 128>}]} {
    %c0 = arith.constant 0 : index
    %c0_0 = arith.constant 0 : index
    %0 = vector.load %arg1[%c0, %c0_0] : memref<16x896xbf16, #tpu.memory_space<vmem>>, vector<16x896xbf16>
    %c0_1 = arith.constant 0 : index
    %c0_2 = arith.constant 0 : index
    %1 = vector.load %arg2[%c0_1, %c0_2] : memref<896x128xbf16, #tpu.memory_space<vmem>>, vector<896x128xbf16>
    %cst = arith.constant dense<0.000000e+00> : vector<16x128xf32>
    %2 = tpu.matmul %0, %1, %cst {dimension_numbers = #tpu.dot_dimension_numbers<[1], [0], [0], [1], [0, 0, 1, 1], [], []>} : vector<16x896xbf16>, vector<896x128xbf16>, vector<16x128xf32> -> vector<16x128xf32>
    %cst_3 = arith.constant 5.000000e-01 : f32
    %3 = vector.broadcast %cst_3 : f32 to vector<16x128xf32>
    %4 = arith.mulf %3, %2 : vector<16x128xf32>
    %5 = math.tanh %4 : vector<16x128xf32>
    %cst_4 = arith.constant 1.000000e+00 : f32
    %6 = vector.broadcast %cst_4 : f32 to vector<16x128xf32>
    %7 = arith.addf %6, %5 : vector<16x128xf32>
    %cst_5 = arith.constant 5.000000e-01 : f32
    %8 = vector.broadcast %cst_5 : f32 to vector<16x128xf32>
    %9 = arith.mulf %8, %7 : vector<16x128xf32>
    %10 = arith.truncf %9 : vector<16x128xf32> to vector<16x128xbf16>
    %c0_6 = arith.constant 0 : index
    %c0_7 = arith.constant 0 : index
    %11 = vector.load %arg3[%c0_6, %c0_7] : memref<128x128xbf16, #tpu.memory_space<vmem>>, vector<128x128xbf16>
    %cst_8 = arith.constant dense<0.000000e+00> : vector<16x128xf32>
    %12 = tpu.matmul %10, %11, %cst_8 {dimension_numbers = #tpu.dot_dimension_numbers<[1], [0], [0], [1], [0, 0, 1, 1], [], []>} : vector<16x128xbf16>, vector<128x128xbf16>, vector<16x128xf32> -> vector<16x128xf32>
    %cst_9 = arith.constant 5.000000e-01 : f32
    %13 = vector.broadcast %cst_9 : f32 to vector<16x128xf32>
    %14 = arith.mulf %13, %12 : vector<16x128xf32>
    %15 = math.tanh %14 : vector<16x128xf32>
    %cst_10 = arith.constant 1.000000e+00 : f32
    %16 = vector.broadcast %cst_10 : f32 to vector<16x128xf32>
    %17 = arith.addf %16, %15 : vector<16x128xf32>
    %cst_11 = arith.constant 5.000000e-01 : f32
    %18 = vector.broadcast %cst_11 : f32 to vector<16x128xf32>
    %19 = arith.mulf %18, %17 : vector<16x128xf32>
    %20 = arith.truncf %19 : vector<16x128xf32> to vector<16x128xbf16>
    %c0_12 = arith.constant 0 : index
    %c0_13 = arith.constant 0 : index
    %21 = vector.load %arg4[%c0_12, %c0_13] : memref<128x128xbf16, #tpu.memory_space<vmem>>, vector<128x128xbf16>
    %cst_14 = arith.constant dense<0.000000e+00> : vector<16x128xf32>
    %22 = tpu.matmul %20, %21, %cst_14 {dimension_numbers = #tpu.dot_dimension_numbers<[1], [0], [0], [1], [0, 0, 1, 1], [], []>} : vector<16x128xbf16>, vector<128x128xbf16>, vector<16x128xf32> -> vector<16x128xf32>
    %c0_15 = arith.constant 0 : index
    %c0_16 = arith.constant 0 : index
    %23 = vector.load %arg5[%c0_15, %c0_16] : memref<16x128xf32, #tpu.memory_space<vmem>>, vector<16x128xf32>
    tpu.vector_store %arg5[%c0_15, %c0_16], %22 {strides = array<i32>} : memref<16x128xf32, #tpu.memory_space<vmem>>, vector<16x128xf32>,
    return
  }
  func.func @transform_0(%arg0: i32) -> (i32, i32) {
    %c0_i32 = arith.constant 0 : i32
    %c0_i32_0 = arith.constant 0 : i32
    return %arg0, %c0_i32 : i32, i32
  }
  func.func @transform_1(%arg0: i32) -> (i32, i32) {
    %c0_i32 = arith.constant 0 : i32
    %c0_i32_0 = arith.constant 0 : i32
    %c0_i32_1 = arith.constant 0 : i32
    return %c0_i32, %c0_i32_0 : i32, i32
  }
  func.func @transform_2(%arg0: i32) -> (i32, i32) {
    %c0_i32 = arith.constant 0 : i32
    %c0_i32_0 = arith.constant 0 : i32
    %c0_i32_1 = arith.constant 0 : i32
    return %c0_i32, %c0_i32_0 : i32, i32
  }
  func.func @transform_3(%arg0: i32) -> (i32, i32) {
    %c0_i32 = arith.constant 0 : i32
    %c0_i32_0 = arith.constant 0 : i32
    %c0_i32_1 = arith.constant 0 : i32
    return %c0_i32, %c0_i32_0 : i32, i32
  }
  func.func @transform_4(%arg0: i32) -> (i32, i32) {
    %c0_i32 = arith.constant 0 : i32
    %c0_i32_0 = arith.constant 0 : i32
    return %arg0, %c0_i32 : i32, i32
  }
}

</mosaic_0001>

<bundles_post_ra>
// kernel: fully_connected_sigmoid_forward.1
= control target key start
LH: loop header
LB: loop body
LE: loop exit
PB: predicated region body
PF: predicated region fallthrough
CT: control target
= control target key end

     0   :  { %9 = vsyncpa [#allocation3], 0  ;;  %s1236_s18 = smov [#allocation2]   ;;  %s1237_s20 = smov 64   ;;  %s1363_s0 = inlined_call_operand.vmem [shape: bf16[16,896], index: 0, kind: input, shape index: {}]   ;;  %s1364_s1 = inlined_call_operand.hbm [shape: bf16[896,128], index: 1, kind: input, shape index: {}]   ;;  %s1365_s2 = inlined_call_operand.vmem [shape: bf16[128,128], index: 2, kind: input, shape index: {}]   ;;  %s1366_s3 = inlined_call_operand.vmem [shape: bf16[128,128], index: 3, kind: input, shape index: {}]   ;;  %s1367_s4 = inlined_call_operand.vmem [shape: f32[16,128], index: 4, kind: output, shape index: {}]  }
   0x1   :  { %s16_s17 = sshll.u32 %s1364_s1, 4  ;;  %s18_s19 = sshll.u32 %s1236_s18, 4  ;;  %s17_s17 = int_to_ptr.hbm [resolvable:$true] %s16_s17  ;;  %s19_s19 = int_to_ptr.vmem [resolvable:$true] %s18_s19 }
   0x2   :  { %s1238_s21 = smov 4  }
   0x3   :  { %24 = dma.hbm_to_vmem [thread:$0]  %s17_s17, 7168, %s19_s19, [#allocation3], %s1237_s20, %s1237_s20, %s1238_s21  }
   0x4   :  { %1234 = dma.done.wait [#allocation3], 7168  }
   0x5   :  { %1235 = vsyncadd [#allocation3], 4294960128  ;;  %v1134_v0 = vld [vmem:[#allocation2 + $0x38] sm:$0xff]  ;;  %v1133_v3 = vld [vmem:[#allocation2 + $0x30] sm:$0xff] }
   0x6   :  { %v1142_v1 = vld [vmem:[#allocation2 + $0x78] sm:$0xff]  ;;  %525 = vmatpush.bf16.msra.mxu0 %v1134_v0  ;;  %v1141_v4 = vld [vmem:[#allocation2 + $0x70] sm:$0xff]  ;;  %v1132_v8 = vld [vmem:[#allocation2 + $0x28] sm:$0xff] }
   0x7   :  { %v1150_v2 = vld [vmem:[#allocation2 + $0xb8] sm:$0xff]  ;;  %539 = vmatpush.bf16.msra.mxu1 %v1142_v1  ;;  %v1149_v6 = vld [vmem:[#allocation2 + $0xb0] sm:$0xff]  ;;  %v1140_v9 = vld [vmem:[#allocation2 + $0x68] sm:$0xff] }
   0x8   :  { %v1158_v5 = vld [vmem:[#allocation2 + $0xf8] sm:$0xff]  ;;  %553 = vmatpush.bf16.msra.mxu2 %v1150_v2  ;;  %v1157_v7 = vld [vmem:[#allocation2 + $0xf0] sm:$0xff]  ;;  %v1148_v10 = vld [vmem:[#allocation2 + $0xa8] sm:$0xff] }
   0x9   :  { %567 = vmatpush.bf16.msra.mxu3 %v1158_v5  ;;  %v1156_v11 = vld [vmem:[#allocation2 + $0xe8] sm:$0xff]  ;;  %v1131_v12 = vld [vmem:[#allocation2 + $0x20] sm:$0xff]  ;;  %v1130_v16 = vld [vmem:[#allocation2 + $0x18] sm:$0xff] }
   0xa   :  { %526 = vmatpush.bf16.msra.mxu0 %v1133_v3  ;;  %v1139_v13 = vld [vmem:[#allocation2 + $0x60] sm:$0xff]  ;;  %v1138_v17 = vld [vmem:[#allocation2 + $0x58] sm:$0xff]  ;;  %v1129_v20 = vld [vmem:[#allocation2 + $0x10] sm:$0xff] }
   0xb   :  { %540 = vmatpush.bf16.msra.mxu1 %v1141_v4  ;;  %v1147_v14 = vld [vmem:[#allocation2 + $0xa0] sm:$0xff]  ;;  %v1146_v18 = vld [vmem:[#allocation2 + $0x98] sm:$0xff]  ;;  %v1137_v21 = vld [vmem:[#allocation2 + $0x50] sm:$0xff] }
   0xc   :  { %554 = vmatpush.bf16.msra.mxu2 %v1149_v6  ;;  %v1155_v15 = vld [vmem:[#allocation2 + $0xe0] sm:$0xff]  ;;  %v1154_v19 = vld [vmem:[#allocation2 + $0xd8] sm:$0xff]  ;;  %v1145_v22 = vld [vmem:[#allocation2 + $0x90] sm:$0xff] }
   0xd   :  { %568 = vmatpush.bf16.msra.mxu3 %v1157_v7  ;;  %v1153_v23 = vld [vmem:[#allocation2 + $0xd0] sm:$0xff]  ;;  %v1128_v24 = vld [vmem:[#allocation2 + $0x8] sm:$0xff]  ;;  %v1127_v27 = vld [vmem:[#allocation2] sm:$0xff] }
   0xe   :  { %527 = vmatpush.bf16.msra.mxu0 %v1132_v8  ;;  %v1136_v25 = vld [vmem:[#allocation2 + $0x48] sm:$0xff]  ;;  %v1135_v29 = vld [vmem:[#allocation2 + $0x40] sm:$0xff]  ;;  %v1166_v31 = vld [vmem:[#allocation2 + $0x138] sm:$0xff] }
   0xf   :  { %541 = vmatpush.bf16.msra.mxu1 %v1140_v9  ;;  %v1144_v26 = vld [vmem:[#allocation2 + $0x88] sm:$0xff]  ;;  %v1143_v30 = vld [vmem:[#allocation2 + $0x80] sm:$0xff]  ;;  %v1123_v34 = vld [vmem:[%s1363_s0 + $0x18] sm:$0xf0] }
  0x10   :  { %555 = vmatpush.bf16.msra.mxu2 %v1148_v10  ;;  %v1152_v28 = vld [vmem:[#allocation2 + $0xc8] sm:$0xff]  ;;  %v806_v33 = vld [vmem:[%s1363_s0] sm:$0xf]  ;;  %v1124_v35 = vld [vmem:[%s1363_s0 + $0x20] sm:$0xf0] }
  0x11   :  { %569 = vmatpush.bf16.msra.mxu3 %v1156_v11  ;;  %v814_v32 = vld [vmem:[%s1363_s0 + $0x8] sm:$0xf]  ;;  %v1120_v36 = vld [vmem:[%s1363_s0 + $0x4] sm:$0xf]  ;;  %v808_v37 = vld [vmem:[%s1363_s0 + $0x1c] sm:$0xf0]  ;;  %v807_v41 = vor.u32 %v1123_v34, %v806_v33 }
  0x12   :  { %528 = vmatpush.bf16.msra.mxu0 %v1131_v12  ;;  %v1174_v38 = vld [vmem:[#allocation2 + $0x178] sm:$0xff]  ;;  %v1151_v40 = vld [vmem:[#allocation2 + $0xc0] sm:$0xff]  ;;  %v815_v42 = vor.u32 %v1124_v35, %v814_v32  ;;  %v1121_v43 = vld [vmem:[%s1363_s0 + $0xc] sm:$0xf]  ;;  %v811_v45 = vor.u32 %v1120_v36, %v808_v37 }
  0x13   :  { %542 = vmatpush.bf16.msra.mxu1 %v1139_v13  ;;  %v1182_v39 = vld [vmem:[#allocation2 + $0x1b8] sm:$0xff]  ;;  %v816_v44 = vld [vmem:[%s1363_s0 + $0x24] sm:$0xf0]  ;;  %v1165_v46 = vld [vmem:[#allocation2 + $0x130] sm:$0xff] }
  0x14   :  { %556 = vmatpush.bf16.msra.mxu2 %v1147_v14  ;;  %v1173_v47 = vld [vmem:[#allocation2 + $0x170] sm:$0xff]  ;;  %v819_v49 = vor.u32 %v1121_v43, %v816_v44  ;;  %v1164_v50 = vld [vmem:[#allocation2 + $0x128] sm:$0xff]  ;;  %v1163_v53 = vld [vmem:[#allocation2 + $0x120] sm:$0xff] }
  0x15   :  { %570 = vmatpush.bf16.msra.mxu3 %v1155_v15  ;;  %v1181_v48 = vld [vmem:[#allocation2 + $0x1b0] sm:$0xff]  ;;  %v1172_v51 = vld [vmem:[#allocation2 + $0x168] sm:$0xff]  ;;  %v1171_v54 = vld [vmem:[#allocation2 + $0x160] sm:$0xff] }
  0x16   :  { %529 = vmatpush.bf16.msra.mxu0 %v1130_v16  ;;  %v1180_v52 = vld [vmem:[#allocation2 + $0x1a8] sm:$0xff]  ;;  %v1179_v55 = vld [vmem:[#allocation2 + $0x1a0] sm:$0xff]  ;;  %v1162_v56 = vld [vmem:[#allocation2 + $0x118] sm:$0xff] }
  0x17   :  { %543 = vmatpush.bf16.msra.mxu1 %v1138_v17  ;;  %v1170_v57 = vld [vmem:[#allocation2 + $0x158] sm:$0xff]  ;;  %v1161_v59 = vld [vmem:[#allocation2 + $0x110] sm:$0xff]  ;;  %v1160_v62 = vld [vmem:[#allocation2 + $0x108] sm:$0xff] }
  0x18   :  { %557 = vmatpush.bf16.msra.mxu2 %v1146_v18  ;;  %v1178_v58 = vld [vmem:[#allocation2 + $0x198] sm:$0xff]  ;;  %v1169_v60 = vld [vmem:[#allocation2 + $0x150] sm:$0xff]  ;;  %v1168_v63 = vld [vmem:[#allocation2 + $0x148] sm:$0xff] }
  0x19   :  { %571 = vmatpush.bf16.msra.mxu3 %v1154_v19  ;;  %v1177_v61 = vld [vmem:[#allocation2 + $0x190] sm:$0xff]  ;;  %v1176_v0 = vld [vmem:[#allocation2 + $0x188] sm:$0xff]  ;;  %v1159_v1 = vld [vmem:[#allocation2 + $0x100] sm:$0xff] }
  0x1a   :  { %530 = vmatpush.bf16.msra.mxu0 %v1129_v20  ;;  %v1167_v2 = vld [vmem:[#allocation2 + $0x140] sm:$0xff]  ;;  %v822_v4 = vld [vmem:[%s1363_s0 + $0x10] sm:$0xf]  ;;  %v1125_v5 = vld [vmem:[%s1363_s0 + $0x28] sm:$0xf0] }
  0x1b   :  { %544 = vmatpush.bf16.msra.mxu1 %v1137_v21  ;;  %v1175_v3 = vld [vmem:[#allocation2 + $0x180] sm:$0xff]  ;;  %v1122_v6 = vld [vmem:[%s1363_s0 + $0x14] sm:$0xf]  ;;  %v824_v7 = vld [vmem:[%s1363_s0 + $0x2c] sm:$0xf0]  ;;  %v823_v10 = vor.u32 %v1125_v5, %v822_v4 }
  0x1c   :  { %558 = vmatpush.bf16.msra.mxu2 %v1145_v22  ;;  %v830_v8 = vld [vmem:[%s1363_s0 + $0x18] sm:$0xf]  ;;  %v1126_v9 = vld [vmem:[%s1363_s0 + $0x30] sm:$0xf0]  ;;  %v827_v11 = vor.u32 %v1122_v6, %v824_v7  ;;  %v1188_v15 = vld [vmem:[%s1365_s2 + $0x28] sm:$0xff] }
  0x1d   :  { %572 = vmatpush.bf16.msra.mxu3 %v1153_v23  ;;  %v831_v12 = vor.u32 %v1126_v9, %v830_v8  ;;  %v1190_v13 = vld [vmem:[%s1365_s2 + $0x38] sm:$0xff]  ;;  %v1189_v14 = vld [vmem:[%s1365_s2 + $0x30] sm:$0xff]  ;;  %v1187_v16 = vld [vmem:[%s1365_s2 + $0x20] sm:$0xff] }
  0x1e   :  { %531 = vmatpush.bf16.msra.mxu0 %v1128_v24  ;;  %v1186_v18 = vld [vmem:[%s1365_s2 + $0x18] sm:$0xff]  ;;  %v1185_v20 = vld [vmem:[%s1365_s2 + $0x10] sm:$0xff]  ;;  %v1184_v24 = vld [vmem:[%s1365_s2 + $0x8] sm:$0xff] }
  0x1f   :  { %545 = vmatpush.bf16.msra.mxu1 %v1136_v25  ;;  %v1198_v33 = vld [vmem:[%s1366_s3 + $0x38] sm:$0xff]  ;;  %v1197_v36 = vld [vmem:[%s1366_s3 + $0x30] sm:$0xff] }
  0x20   :  { %559 = vmatpush.bf16.msra.mxu2 %v1144_v26 }
  0x21   :  { %573 = vmatpush.bf16.msra.mxu3 %v1152_v28  ;;  %v1183_v28 = vld [vmem:[%s1365_s2] sm:$0xff] }
  0x22   :  { %532 = vmatpush.bf16.msra.mxu0 %v1127_v27 }
  0x23   :  { %546 = vmatpush.bf16.msra.mxu1 %v1135_v29 }
  0x24   :  { %560 = vmatpush.bf16.msra.mxu2 %v1143_v30 }
  0x25   :  { %574 = vmatpush.bf16.msra.mxu3 %v1151_v40  ;;  %533 = vmatmul.bf16.vlgmr.msra.gmra.mxu0 %v807_v41 }
  0x26   :  { %581 = vmatpush.bf16.msrb.mxu0 %v1166_v31  ;;  %547 = vmatmul.bf16.vlgmr.msra.gmra.mxu1 %v811_v45 }
  0x27   :  { %595 = vmatpush.bf16.msrb.mxu1 %v1174_v38  ;;  %561 = vmatmul.bf16.vlgmr.msra.gmra.mxu2 %v815_v42 }
  0x28   :  { %609 = vmatpush.bf16.msrb.mxu2 %v1182_v39  ;;  %575 = vmatmul.bf16.vlgmr.msra.gmra.mxu3 %v819_v49 }
  0x29   :  { %696 = vmatpush.bf16.msrb.mxu3 %v1190_v13 }
  0x2a   :  { %582 = vmatpush.bf16.msrb.mxu0 %v1165_v46 }
  0x2b   :  { %596 = vmatpush.bf16.msrb.mxu1 %v1173_v47 }
  0x2c   :  { %610 = vmatpush.bf16.msrb.mxu2 %v1181_v48 }
  0x2d   :  { %697 = vmatpush.bf16.msrb.mxu3 %v1189_v14 }
  0x2e   :  { %583 = vmatpush.bf16.msrb.mxu0 %v1164_v50 }
  0x2f   :  { %597 = vmatpush.bf16.msrb.mxu1 %v1172_v51 }
  0x30   :  { %611 = vmatpush.bf16.msrb.mxu2 %v1180_v52 }
  0x31   :  { %698 = vmatpush.bf16.msrb.mxu3 %v1188_v15 }
  0x32   :  { %584 = vmatpush.bf16.msrb.mxu0 %v1163_v53 }
  0x33   :  { %598 = vmatpush.bf16.msrb.mxu1 %v1171_v54 }
  0x34   :  { %612 = vmatpush.bf16.msrb.mxu2 %v1179_v55 }
  0x35   :  { %699 = vmatpush.bf16.msrb.mxu3 %v1187_v16 }
  0x36   :  { %585 = vmatpush.bf16.msrb.mxu0 %v1162_v56 }
  0x37   :  { %599 = vmatpush.bf16.msrb.mxu1 %v1170_v57 }
  0x38   :  { %613 = vmatpush.bf16.msrb.mxu2 %v1178_v58  ;;  %v1196_v58 = vld [vmem:[%s1366_s3 + $0x28] sm:$0xff] }
  0x39   :  { %700 = vmatpush.bf16.msrb.mxu3 %v1186_v18 }
  0x3a   :  { %586 = vmatpush.bf16.msrb.mxu0 %v1161_v59  ;;  %v1195_v59 = vld [vmem:[%s1366_s3 + $0x20] sm:$0xff] }
  0x3b   :  { %600 = vmatpush.bf16.msrb.mxu1 %v1169_v60  ;;  %v1194_v60 = vld [vmem:[%s1366_s3 + $0x18] sm:$0xff] }
  0x3c   :  { %614 = vmatpush.bf16.msrb.mxu2 %v1177_v61  ;;  %v1193_v61 = vld [vmem:[%s1366_s3 + $0x10] sm:$0xff] }
  0x3d   :  { %701 = vmatpush.bf16.msrb.mxu3 %v1185_v20 }
  0x3e   :  { %587 = vmatpush.bf16.msrb.mxu0 %v1160_v62  ;;  %v1192_v62 = vld [vmem:[%s1366_s3 + $0x8] sm:$0xff] }
  0x3f   :  { %601 = vmatpush.bf16.msrb.mxu1 %v1168_v63  ;;  %v1191_v63 = vld [vmem:[%s1366_s3] sm:$0xff] }
  0x40   :  { %615 = vmatpush.bf16.msrb.mxu2 %v1176_v0 }
  0x41   :  { %702 = vmatpush.bf16.msrb.mxu3 %v1184_v24 }
  0x42   :  { %588 = vmatpush.bf16.msrb.mxu0 %v1159_v1 }
  0x43   :  { %602 = vmatpush.bf16.msrb.mxu1 %v1167_v2 }
  0x44   :  { %616 = vmatpush.bf16.msrb.mxu2 %v1175_v3 }
  0x45   :  { %589 = vmatmul.bf16.vlgmr.msrb.gmra.mxu0 %v823_v10  ;;  %703 = vmatpush.bf16.msrb.mxu3 %v1183_v28 }
  0x46   :  { %603 = vmatmul.bf16.vlgmr.msrb.gmra.mxu1 %v827_v11  ;;  %783 = vmatpush.bf16.msra.mxu0 %v1198_v33 }
  0x47   :  { %617 = vmatmul.bf16.vlgmr.msrb.gmra.mxu2 %v831_v12 }
  0x4a   :  { %784 = vmatpush.bf16.msra.mxu0 %v1197_v36 }
  0x4e   :  { %785 = vmatpush.bf16.msra.mxu0 %v1196_v58 }
  0x52   :  { %786 = vmatpush.bf16.msra.mxu0 %v1195_v59 }
  0x56   :  { %787 = vmatpush.bf16.msra.mxu0 %v1194_v60 }
  0x5a   :  { %788 = vmatpush.bf16.msra.mxu0 %v1193_v61 }
  0x5e   :  { %789 = vmatpush.bf16.msra.mxu0 %v1192_v62 }
  0x62   :  { %790 = vmatpush.bf16.msra.mxu0 %v1191_v63 }
  0xa2   :  { %v534_v17 = vpop.f32.mrf.mxu0 }
  0xa3   :  { %v548_v19 = vpop.f32.mrf.mxu1 }
  0xa4   :  { %v549_v22 = vadd.f32 %v548_v19, %v534_v17 }
  0xaa   :  { %v562_v21 = vpop.f32.mrf.mxu2  ;;  %v536_v23 = vpop.f32.mrf.mxu0 }
  0xab   :  { %v576_v25 = vpop.f32.mrf.mxu3  ;;  %v550_v26 = vpop.f32.mrf.mxu1  ;;  %v563_v27 = vadd.f32 %v562_v21, %v549_v22 }
  0xac   :  { %v551_v31 = vadd.f32 %v550_v26, %v536_v23 }
  0xad   :  { %v577_v30 = vadd.f32 %v576_v25, %v563_v27 }
  0xb2   :  { %v564_v29 = vpop.f32.mrf.mxu2 }
  0xb3   :  { %v565_v37 = vadd.f32 %v564_v29, %v551_v31  ;;  %v578_v38 = vpop.f32.mrf.mxu3 }
  0xb5   :  { %v579_v41 = vadd.f32 %v578_v38, %v565_v37 }
  0xc2   :  { %v590_v32 = vpop.f32.mrf.mxu0 }
  0xc3   :  { %v591_v34 = vadd.f32 %v590_v32, %v577_v30  ;;  %v604_v35 = vpop.f32.mrf.mxu1 }
  0xc5   :  { %v605_v39 = vadd.f32 %v604_v35, %v591_v34 }
  0xca   :  { %v618_v40 = vpop.f32.mrf.mxu2  ;;  %v592_v43 = vpop.f32.mrf.mxu0 }
  0xcb   :  { %v619_v42 = vadd.f32 %v618_v40, %v605_v39  ;;  %v593_v44 = vadd.f32 %v592_v43, %v579_v41  ;;  %v606_v46 = vpop.f32.mrf.mxu1 }
  0xcd   :  { %v623_v45 = vmul.f32 0.5, %v619_v42  ;;  %v607_v47 = vadd.f32 %v606_v46, %v593_v44 }
  0xcf   :  { %1202 = vtanh.f32 %v623_v45 }
  0xd2   :  { %v620_v48 = vpop.f32.mrf.mxu2 }
  0xd3   :  { %v621_v49 = vadd.f32 %v620_v48, %v607_v47 }
  0xd5   :  { %v624_v50 = vmul.f32 0.5, %v621_v49  ;;  %v1203_v51 = vpop.eup %1202 }
  0xd6   :  { %v627_v52 = vadd.f32 1.0, %v1203_v51 }
  0xd7   :  { %1204 = vtanh.f32 %v624_v50 }
  0xd8   :  { %v629_v55 = vmul.f32 0.5, %v627_v52 }
  0xdd   :  { %v1205_v53 = vpop.eup %1204 }
  0xde   :  { %v628_v54 = vadd.f32 1.0, %v1205_v53 }
  0xe0   :  { %v630_v56 = vmul.f32 0.5, %v628_v54 }
  0xe2   :  { %v631_v57 = vpack.c.bf16 %v630_v56, %v629_v55 }
  0xe4   :  { %704 = vmatmul.bf16.vlgmr.msrb.gmra.mxu3 %v631_v57 }
 0x167   :  { %v705_v0 = vpop.f32.mrf.mxu3 }
 0x168   :  { %v710_v1 = vmul.f32 0.5, %v705_v0 }
 0x16a   :  { %1206 = vtanh.f32 %v710_v1 }
 0x16f   :  { %v707_v2 = vpop.f32.mrf.mxu3 }
 0x170   :  { %v711_v3 = vmul.f32 0.5, %v707_v2  ;;  %v1207_v4 = vpop.eup %1206 }
 0x171   :  { %v714_v5 = vadd.f32 1.0, %v1207_v4 }
 0x172   :  { %1208 = vtanh.f32 %v711_v3 }
 0x173   :  { %v716_v8 = vmul.f32 0.5, %v714_v5 }
 0x178   :  { %v1209_v6 = vpop.eup %1208 }
 0x179   :  { %v715_v7 = vadd.f32 1.0, %v1209_v6 }
 0x17b   :  { %v717_v9 = vmul.f32 0.5, %v715_v7 }
 0x17d   :  { %v718_v10 = vpack.c.bf16 %v717_v9, %v716_v8 }
 0x17f   :  { %791 = vmatmul.bf16.vlgmr.msra.gmra.mxu0 %v718_v10 }
 0x1fc   :  { %v792_v11 = vpop.f32.mrf.mxu0 }
 0x1fd   :  { %797 = vst [vmem:[%s1367_s4] sm:$0xff] %v792_v11 }
 0x204   :  { %v794_v12 = vpop.f32.mrf.mxu0 }
 0x205   :  { %798 = vst [vmem:[%s1367_s4 + $0x8] sm:$0xff] %v794_v12 }
 0x206   :  { %803 = vsyncpa [#allocation3], 1 }

</bundles_post_ra>
